<compile_context>
chip_gen: v7x
topology: tpu7x:2x2x1
jax: 0.10.0
libtpu: 0.0.40
codegen_flags: <defaults>
</compile_context>

<pallas_src>
import functools

import jax
import jax.numpy as jnp
from jax.experimental import pallas as pl
from jax.experimental.pallas import tpu as pltpu

EPS = 1e-6


def _round_up(v, m):
    return ((v + m - 1) // m) * m


def patch_embed_kernel(x_ref, w_ref, s_ref, o_ref, *, e_real, pad_cols):
    # x_ref: [TM, Kp]  (compute dtype, e.g. bf16)
    # w_ref: [Kp, Ep]  (compute dtype; zero in padded rows/cols)
    # s_ref: [3,  Ep]  f32 rows = (conv bias, gamma, beta); zero in padded cols
    # o_ref: [TM, Ep]
    y = jnp.dot(x_ref[...], w_ref[...], preferred_element_type=jnp.float32)
    s = s_ref[...]
    y = y + s[0:1, :]                      # padded E columns stay exactly 0

    # Two-pass (centered) LayerNorm statistics in f32 over the real E columns.
    # Padded columns of y are exactly 0, so after centering they each
    # contribute mean^2 to the squared sum -> subtract that exactly.
    inv_e = 1.0 / e_real
    mean = jnp.sum(y, axis=-1, keepdims=True) * inv_e
    d = y - mean
    var = (jnp.sum(d * d, axis=-1, keepdims=True)
           - pad_cols * mean * mean) * inv_e
    var = jnp.maximum(var, 0.0)
    y_hat = d * jax.lax.rsqrt(var + EPS)
    # gamma/beta are 0 in padded columns -> padded output columns are 0.
    o_ref[...] = (y_hat * s[1:2, :] + s[2:3, :]).astype(o_ref.dtype)


def patch_embedding_forward(x, conv_w, conv_b, gamma, beta, patch_size, *,
                            block_m=None, compute_dtype=jnp.bfloat16,
                            out_dtype=jnp.bfloat16, allow_input_fusion=False):
    """x: [B, C, H, W] NCHW. Returns [B, N, E] in out_dtype (default bf16)."""
    B, C, H, W = x.shape
    p = patch_size
    E = conv_w.shape[0]
    Hp, Wp = H // p, W // p
    N = Hp * Wp
    K = C * p * p
    M = B * N

    cbytes = jnp.dtype(compute_dtype).itemsize
    obytes = jnp.dtype(out_dtype).itemsize

    # Lane-dense K / E (pad only if not already a multiple of 128).
    Kp = _round_up(K, 128)
    Ep = _round_up(E, 128)

    # --- VMEM budget: 75% of physical capacity (leaves Mosaic scratch
    # headroom, which matters on v7x's 64 MiB).
    try:
        vmem_cap = int(pltpu.get_tpu_info().vmem_capacity_bytes)
    except Exception:
        vmem_cap = 64 * 1024 * 1024          # conservative fallback
    vmem_budget = (vmem_cap * 3) // 4

    if block_m is None:
        block_m = 2048 if vmem_cap > 64 * 1024 * 1024 else 1024

    # --- pick the M tile: start from block_m, shrink only if VMEM demands it,
    # then keep the grid long enough (>=4 steps) for the 2 v7x TensorCores.
    resident = Kp * Ep * cbytes + 3 * Ep * 4          # single-buffered operands
    def _footprint(t):
        return (2 * t * Kp * cbytes       # double-buffered input tile
                + 2 * t * Ep * obytes     # double-buffered output tile
                + t * Ep * 4              # f32 matmul / LayerNorm intermediate
                + resident)

    TM = _round_up(min(block_m, _round_up(M, 8)), 8)
    while TM > 256 and _footprint(TM) > vmem_budget:
        TM = _round_up(TM // 2, 8)
    while TM > 512 and pl.cdiv(M, TM) < 4:
        TM = _round_up(TM // 2, 8)
    grid_m = pl.cdiv(M, TM)

    # --- layout glue (XLA): patch extraction + weight repack.
    # Cast to the compute dtype BEFORE the transpose so the HBM transpose
    # traffic is halved.
    xc = x.astype(compute_dtype)
    xp = xc.reshape(B, C, Hp, p, Wp, p)
    xp = jnp.transpose(xp, (0, 2, 4, 1, 3, 5))         # [B, Hp, Wp, C, p, p]
    xp = xp.reshape(M, K)
    if Kp != K:                                        # no row padding at all
        xp = jnp.pad(xp, ((0, 0), (0, Kp - K)))
    # TODO(synk): the 6-D patch transpose is still an XLA HBM pre-pass; fully
    # removing it requires an NHWC input layout upstream (then only the small
    # conv weight would need permuting).  allow_input_fusion=True asks XLA to
    # try fusing it into the Pallas operand read.

    # Conv weight [E, C, p, p] -> [K, E], zero-padded to [Kp, Ep].
    w_mat = conv_w.reshape(E, K).T.astype(compute_dtype)
    if (Kp, Ep) != (K, E):
        w_mat = jnp.pad(w_mat, ((0, Kp - K), (0, Ep - E)))
    # Pack bias / gamma / beta into ONE (3, Ep) f32 operand (single DMA).
    scales = jnp.stack([
        jnp.pad(conv_b.astype(jnp.float32), (0, Ep - E)),
        jnp.pad(gamma.astype(jnp.float32), (0, Ep - E)),
        jnp.pad(beta.astype(jnp.float32), (0, Ep - E)),
    ])

    cost = pl.CostEstimate(
        flops=2 * M * Kp * Ep,
        transcendentals=M,                              # one rsqrt per row
        bytes_accessed=(M * Kp * cbytes + Kp * Ep * cbytes
                        + M * Ep * obytes + 3 * Ep * 4),
    )

    cp_kwargs = dict(
        dimension_semantics=("parallel",),              # megacore-shardable M
        vmem_limit_bytes=int(vmem_budget),
    )
    if allow_input_fusion:
        # Let XLA fuse the patch transpose into the activation operand read.
        cp_kwargs["allow_input_fusion"] = [True, False, False]

    kernel = functools.partial(patch_embed_kernel,
                               e_real=float(E), pad_cols=float(Ep - E))
    out = pl.pallas_call(
        kernel,
        out_shape=jax.ShapeDtypeStruct((M, Ep), out_dtype),
        grid=(grid_m,),
        in_specs=[
            # Streamed patch rows (double-buffered, ragged last block masked).
            pl.BlockSpec((TM, Kp), lambda i: (i, 0)),
            # Resident, fetched once -> single buffer.
            pl.BlockSpec((Kp, Ep), lambda i: (0, 0),
                         pipeline_mode=pl.Buffered(buffer_count=1)),
            pl.BlockSpec((3, Ep), lambda i: (0, 0),
                         pipeline_mode=pl.Buffered(buffer_count=1)),
        ],
        out_specs=pl.BlockSpec((TM, Ep), lambda i: (i, 0)),
        compiler_params=pltpu.CompilerParams(**cp_kwargs),
        cost_estimate=cost,
    )(xp, w_mat, scales)

    if Ep != E:
        out = out[:, :E]
    return out.reshape(B, N, E)


if __name__ == "__main__":
    # Small, forward-consistent shapes:
    #   img_size=16, patch_size=4, in_channels=4, embed_dim=32, batch=2
    #   -> num_patches = (16/4)^2 = 16
    B, C, H, W = 2, 4, 16, 16
    p = 4
    E = 32

    key = jax.random.PRNGKey(0)
    kx, kw, kb, kg, kbe = jax.random.split(key, 5)

    x = jax.random.normal(kx, (B, C, H, W), dtype=jnp.float32)
    conv_w = jax.random.normal(kw, (E, C, p, p), dtype=jnp.float32) * 0.02
    conv_b = jax.random.normal(kb, (E,), dtype=jnp.float32) * 0.02
    gamma = 1.0 + 0.1 * jax.random.normal(kg, (E,), dtype=jnp.float32)
    beta = 0.1 * jax.random.normal(kbe, (E,), dtype=jnp.float32)

    out = patch_embedding_forward(x, conv_w, conv_b, gamma, beta, patch_size=p)
    out = jax.block_until_ready(out)

    # Reference: same math in plain JAX with inputs quantized to bf16 exactly
    # as the kernel sees them (checks kernel mechanics, not bf16 rounding).
    Hp, Wp = H // p, W // p
    x_q = x.astype(jnp.bfloat16).astype(jnp.float32)
    w_q = conv_w.astype(jnp.bfloat16).astype(jnp.float32)
    xr = x_q.reshape(B, C, Hp, p, Wp, p).transpose(0, 2, 4, 1, 3, 5)
    xr = xr.reshape(B, Hp * Wp, C * p * p)
    ref = xr @ w_q.reshape(E, -1).T + conv_b
    mu = ref.mean(-1, keepdims=True)
    var = ((ref - mu) ** 2).mean(-1, keepdims=True)
    ref = (ref - mu) / jnp.sqrt(var + EPS) * gamma + beta

    assert out.shape == (B, Hp * Wp, E), out.shape
    assert out.dtype == jnp.bfloat16, out.dtype
    err = float(jnp.abs(out.astype(jnp.float32) - ref).max())
    assert err < 3e-2, err

    print("KERNEL_OK")
</pallas_src>

<mosaic_0001>
module attributes {stable_mosaic.version = 11 : i64} {
  func.func @patch_embed_kernel(%arg0: i32, %arg1: memref<32x128xbf16, #tpu.memory_space<vmem>>, %arg2: memref<128x128xbf16, #tpu.memory_space<vmem>>, %arg3: memref<3x128xf32, #tpu.memory_space<vmem>>, %arg4: memref<32x128xbf16, #tpu.memory_space<vmem>>) attributes {dimension_semantics = [#tpu.dimension_semantics<parallel>], iteration_bounds = array<i64: 1>, scalar_prefetch = 0 : i64, scratch_operands = 0 : i64, tpu.core_type = #tpu.core_type<tc>, window_params = [{transform_indices = @transform_0, window_bounds = array<i64: 32, 128>}, {pipeline_mode = #tpu.pipeline_mode<synchronous>, transform_indices = @transform_1, window_bounds = array<i64: 128, 128>}, {pipeline_mode = #tpu.pipeline_mode<synchronous>, transform_indices = @transform_2, window_bounds = array<i64: 3, 128>}, {transform_indices = @transform_3, window_bounds = array<i64: 32, 128>}]} {
    %c0 = arith.constant 0 : index
    %c0_0 = arith.constant 0 : index
    %0 = vector.load %arg1[%c0, %c0_0] : memref<32x128xbf16, #tpu.memory_space<vmem>>, vector<32x128xbf16>
    %c0_1 = arith.constant 0 : index
    %c0_2 = arith.constant 0 : index
    %1 = vector.load %arg2[%c0_1, %c0_2] : memref<128x128xbf16, #tpu.memory_space<vmem>>, vector<128x128xbf16>
    %cst = arith.constant dense<0.000000e+00> : vector<32x128xf32>
    %2 = tpu.matmul %0, %1, %cst {dimension_numbers = #tpu.dot_dimension_numbers<[1], [0], [0], [1], [0, 0, 1, 1], [], []>} : vector<32x128xbf16>, vector<128x128xbf16>, vector<32x128xf32> -> vector<32x128xf32>
    %c0_3 = arith.constant 0 : index
    %c0_4 = arith.constant 0 : index
    %3 = vector.load %arg3[%c0_3, %c0_4] : memref<3x128xf32, #tpu.memory_space<vmem>>, vector<3x128xf32>
    %4 = vector.extract_strided_slice %3 {offsets = [0, 0], sizes = [1, 128], strides = [1, 1]} : vector<3x128xf32> to vector<1x128xf32>
    %5 = vector.broadcast %4 : vector<1x128xf32> to vector<32x128xf32>
    %6 = arith.addf %2, %5 : vector<32x128xf32>
    %cst_5 = arith.constant dense<0.000000e+00> : vector<32xf32>
    %7 = vector.multi_reduction <add>, %6, %cst_5 [1] : vector<32x128xf32> to vector<32xf32>
    %8 = vector.shape_cast %7 : vector<32xf32> to vector<32x1xf32>
    %cst_6 = arith.constant 3.125000e-02 : f32
    %9 = vector.broadcast %cst_6 : f32 to vector<32x1xf32>
    %10 = arith.mulf %8, %9 : vector<32x1xf32>
    %11 = vector.broadcast %10 : vector<32x1xf32> to vector<32x128xf32>
    %12 = arith.subf %6, %11 : vector<32x128xf32>
    %13 = arith.mulf %12, %12 : vector<32x128xf32>
    %cst_7 = arith.constant dense<0.000000e+00> : vector<32xf32>
    %14 = vector.multi_reduction <add>, %13, %cst_7 [1] : vector<32x128xf32> to vector<32xf32>
    %15 = vector.shape_cast %14 : vector<32xf32> to vector<32x1xf32>
    %cst_8 = arith.constant 9.600000e+01 : f32
    %16 = vector.broadcast %cst_8 : f32 to vector<32x1xf32>
    %17 = arith.mulf %16, %10 : vector<32x1xf32>
    %18 = arith.mulf %17, %10 : vector<32x1xf32>
    %19 = arith.subf %15, %18 : vector<32x1xf32>
    %cst_9 = arith.constant 3.125000e-02 : f32
    %20 = vector.broadcast %cst_9 : f32 to vector<32x1xf32>
    %21 = arith.mulf %19, %20 : vector<32x1xf32>
    %cst_10 = arith.constant 0.000000e+00 : f32
    %22 = vector.broadcast %cst_10 : f32 to vector<32x1xf32>
    %23 = arith.maximumf %21, %22 : vector<32x1xf32>
    %cst_11 = arith.constant 9.99999997E-7 : f32
    %24 = vector.broadcast %cst_11 : f32 to vector<32x1xf32>
    %25 = arith.addf %23, %24 : vector<32x1xf32>
    %26 = math.rsqrt %25 : vector<32x1xf32>
    %27 = vector.broadcast %26 : vector<32x1xf32> to vector<32x128xf32>
    %28 = arith.mulf %12, %27 : vector<32x128xf32>
    %29 = vector.extract_strided_slice %3 {offsets = [1, 0], sizes = [1, 128], strides = [1, 1]} : vector<3x128xf32> to vector<1x128xf32>
    %30 = vector.broadcast %29 : vector<1x128xf32> to vector<32x128xf32>
    %31 = arith.mulf %28, %30 : vector<32x128xf32>
    %32 = vector.extract_strided_slice %3 {offsets = [2, 0], sizes = [1, 128], strides = [1, 1]} : vector<3x128xf32> to vector<1x128xf32>
    %33 = vector.broadcast %32 : vector<1x128xf32> to vector<32x128xf32>
    %34 = arith.addf %31, %33 : vector<32x128xf32>
    %35 = arith.truncf %34 : vector<32x128xf32> to vector<32x128xbf16>
    %c0_12 = arith.constant 0 : index
    %c0_13 = arith.constant 0 : index
    %36 = vector.load %arg4[%c0_12, %c0_13] : memref<32x128xbf16, #tpu.memory_space<vmem>>, vector<32x128xbf16>
    tpu.vector_store %arg4[%c0_12, %c0_13], %35 {strides = array<i32>} : memref<32x128xbf16, #tpu.memory_space<vmem>>, vector<32x128xbf16>,
    return
  }
  func.func @transform_0(%arg0: i32) -> (i32, i32) {
    %c0_i32 = arith.constant 0 : i32
    %c0_i32_0 = arith.constant 0 : i32
    return %arg0, %c0_i32 : i32, i32
  }
  func.func @transform_1(%arg0: i32) -> (i32, i32) {
    %c0_i32 = arith.constant 0 : i32
    %c0_i32_0 = arith.constant 0 : i32
    %c0_i32_1 = arith.constant 0 : i32
    return %c0_i32, %c0_i32_0 : i32, i32
  }
  func.func @transform_2(%arg0: i32) -> (i32, i32) {
    %c0_i32 = arith.constant 0 : i32
    %c0_i32_0 = arith.constant 0 : i32
    %c0_i32_1 = arith.constant 0 : i32
    return %c0_i32, %c0_i32_0 : i32, i32
  }
  func.func @transform_3(%arg0: i32) -> (i32, i32) {
    %c0_i32 = arith.constant 0 : i32
    %c0_i32_0 = arith.constant 0 : i32
    return %arg0, %c0_i32 : i32, i32
  }
}

</mosaic_0001>

<bundles_post_ra>
// kernel: tpu_custom_call.1
= control target key start
LH: loop header
LB: loop body
LE: loop exit
PB: predicated region body
PF: predicated region fallthrough
CT: control target
= control target key end

     0   :  { %8 = vsyncpa [#allocation3], 0  ;;  %s529_s0 = inlined_call_operand.hbm [shape: bf16[32,128], index: 0, kind: input, shape index: {}]   ;;  %s530_s1 = inlined_call_operand.hbm [shape: bf16[128,128], index: 1, kind: input, shape index: {}]   ;;  %s531_s2 = inlined_call_operand.vmem [shape: f32[3,128], index: 2, kind: input, shape index: {}]   ;;  %s532_s3 = inlined_call_operand.hbm [shape: bf16[32,128], index: 3, kind: output, shape index: {}]  }
   0x1   :  { %9 = vsyncpa [#allocation6], 0 }
   0x2   :  { %10 = vsyncpa [#allocation4], 0  ;;  %s446_s12 = smov [#allocation2]   ;;  %s374_s16 = scalar_lea.hbm %s529_s0, 256 }
   0x3   :  { %s16_s13 = sshll.u32 %s446_s12, 4  ;;  %p375_p0 = scmp.ne.s32.totalorder %s529_s0, %s374_s16  ;;  %s17_s13 = int_to_ptr.vmem [resolvable:$true] %s16_s13 }
   0x4   :  { %p378_p1 = scmp.lt.u32.totalorder %s374_s16, %s529_s0 }
   0x6   :  { %p380_p2 = pnand %p378_p1, %p375_p0 }
   0x8   :  { %383 = shalt.err (!%p380_p2)
}
   0x9   :  { %s384_s21 = scalar_lea.vmem %s17_s13, 256  ;;  %p389_p4 = scmp.lt.s32.totalorder %s17_s13, %s17_s13 }
   0xa   :  { %p385_p3 = scmp.ne.s32.totalorder %s17_s13, %s384_s21  ;;  %p390_p5 = scmp.lt.s32.totalorder %s384_s21, %s384_s21 }
   0xc   :  { %p391_p6 = por %p390_p5, %p389_p4 }
   0xe   :  { %p392_p7 = pnand %p391_p6, %p385_p3 }
  0x10   :  { %395 = shalt.err (!%p392_p7)
}
  0x11   :  { %s447_s22 = smov 64   ;;  %s448_s23 = smov 4  }
  0x12   :  { %22 = dma.hbm_to_vmem [thread:$0]  %s529_s0, 256, %s17_s13, [#allocation3], %s447_s22, %s447_s22, %s448_s23  }
  0x13   :  { %s449_s26 = smov [#allocation5]   ;;  %s396_s30 = scalar_lea.hbm %s530_s1, 1024 }
  0x14   :  { %s28_s27 = sshll.u32 %s449_s26, 4  ;;  %p397_p8 = scmp.ne.s32.totalorder %s530_s1, %s396_s30  ;;  %s29_s27 = int_to_ptr.vmem [resolvable:$true] %s28_s27 }
  0x15   :  { %p400_p9 = scmp.lt.u32.totalorder %s396_s30, %s530_s1 }
  0x17   :  { %p402_p10 = pnand %p400_p9, %p397_p8 }
  0x19   :  { %405 = shalt.err (!%p402_p10)
}
  0x1a   :  { %s406_s8 = scalar_lea.vmem %s29_s27, 1024  ;;  %p411_p12 = scmp.lt.s32.totalorder %s29_s27, %s29_s27 }
  0x1b   :  { %p407_p11 = scmp.ne.s32.totalorder %s29_s27, %s406_s8  ;;  %p412_p13 = scmp.lt.s32.totalorder %s406_s8, %s406_s8 }
  0x1d   :  { %p413_p0 = por %p412_p13, %p411_p12 }
  0x1f   :  { %p414_p1 = pnand %p413_p0, %p407_p11 }
  0x21   :  { %417 = shalt.err (!%p414_p1)
}
  0x22   :  { %34 = dma.hbm_to_vmem [thread:$0]  %s530_s1, 1024, %s29_s27, [#allocation6], %s447_s22, %s447_s22, %s448_s23  }
  0x23   :  { %440 = dma.done.wait [#allocation3], 256  }
  0x24   :  { %441 = vsyncadd [#allocation3], 4294967040 }
  0x25   :  { %442 = dma.done.wait [#allocation6], 1024  }
  0x26   :  { %443 = vsyncadd [#allocation6], 4294966272  ;;  %v356_v0 = vld [vmem:[#allocation5] sm:$0xff]   ;;  %v357_v1 = vld [vmem:[#allocation5 + $0x8] sm:$0xff]   ;;  %v65_v10 = vlaneseq }
  0x27   :  { %331 = vmatprep.subr.bf16.mxu0 %v356_v0  ;;  %v358_v2 = vld [vmem:[#allocation5 + $0x10] sm:$0xff]   ;;  %v359_v3 = vld [vmem:[#allocation5 + $0x18] sm:$0xff]   ;;  %v360_v5 = vld [vmem:[#allocation5 + $0x20] sm:$0xff]  }
  0x28   :  { %332 = vmatpush3.bf16.msra.mxu0 %v356_v0  ;;  %v364_v4 = vld [vmem:[#allocation2] sm:$0xff]   ;;  %v361_v6 = vld [vmem:[#allocation5 + $0x28] sm:$0xff]   ;;  %v363_v8 = vld [vmem:[#allocation5 + $0x38] sm:$0xff]   ;;  %v501_v11 = vshrl.u32 %v65_v10, 7 }
  0x29   :  { %333 = vmatprep.subr.bf16.mxu0 %v357_v1  ;;  %347 = vmatprep.mubr.bf16.mxu0 %v364_v4  ;;  %v362_v7 = vld [vmem:[#allocation5 + $0x30] sm:$0xff]   ;;  %v365_v9 = vld [vmem:[#allocation2 + $0x8] sm:$0xff]  }
  0x2a   :  { %v67_v12 = vsub.s32 0, %v501_v11  ;;  %v507_v13 = vld [vmem:[%s531_s2] sm:$0x7]  ;;  %s450_s2 = smov [#allocation7]  }
  0x2b   :  { %s279_s11 = sshll.u32 %s450_s2, 4  ;;  %s280_s11 = int_to_ptr.vmem [resolvable:$true] %s279_s11 }
  0x2c   :  { %334 = vmatpush3.bf16.msra.mxu0 %v357_v1  ;;  %v68_v14 = vrot.slane %v507_v13, %v67_v12  ;;  %s418_s12 = scalar_lea.vmem %s280_s11, 256  ;;  %p423_p3 = scmp.lt.s32.totalorder %s280_s11, %s280_s11 }
  0x2d   :  { %335 = vmatprep.subr.bf16.mxu0 %v358_v2  ;;  %p419_p2 = scmp.ne.s32.totalorder %s280_s11, %s418_s12  ;;  %p424_p4 = scmp.lt.s32.totalorder %s418_s12, %s418_s12 }
  0x2f   :  { %p425_p5 = por %p424_p4, %p423_p3 }
  0x30   :  { %336 = vmatpush3.bf16.msra.mxu0 %v358_v2 }
  0x31   :  { %337 = vmatprep.subr.bf16.mxu0 %v359_v3  ;;  %p426_p6 = pnand %p425_p5, %p419_p2 }
  0x34   :  { %338 = vmatpush3.bf16.msra.mxu0 %v359_v3  ;;  %v240_v3 = vsub.s32 1, %v501_v11 }
  0x35   :  { %339 = vmatprep.subr.bf16.mxu0 %v360_v5 }
  0x38   :  { %340 = vmatpush3.bf16.msra.mxu0 %v360_v5  ;;  %v241_v5 = vrot.slane %v507_v13, %v240_v3 }
  0x39   :  { %341 = vmatprep.subr.bf16.mxu0 %v361_v6 }
  0x3c   :  { %342 = vmatpush3.bf16.msra.mxu0 %v361_v6  ;;  %v248_v6 = vsub.s32 2, %v501_v11 }
  0x3d   :  { %343 = vmatprep.subr.bf16.mxu0 %v362_v7 }
  0x3e   :  { %v249_v10 = vrot.slane %v507_v13, %v248_v6 }
  0x40   :  { %344 = vmatpush3.bf16.msra.mxu0 %v362_v7 }
  0x41   :  { %345 = vmatprep.subr.bf16.mxu0 %v363_v8 }
  0x44   :  { %346 = vmatpush3.bf16.msra.mxu0 %v363_v8 }
  0x47   :  { %348 = vmatmul.mubr.bf16.vlgmr.msra.gmra.mrb[0].mxu0 %v365_v9 }
 0x11a   :  { %v349_v15 = vpop.f32.mrb[0].mxu0 }
 0x11b   :  { %v172_v16 = vadd.f32 %v349_v15, %v68_v14  ;;  %v163_v17 = vpop.f32.mrb[1].mxu0 }
 0x11c   :  { %v164_v18 = vadd.f32 %v163_v17, %v68_v14  ;;  %v350_v19 = vpop.f32.mrb[2].mxu0 }
 0x11d   :  { %182 = vadd.xlane.f32.xlu1 %v172_v16  ;;  %v166_v20 = vpop.f32.mrb[3].mxu0  ;;  %v175_v21 = vadd.f32 %v350_v19, %v68_v14 }
 0x11e   :  { %178 = vadd.xlane.f32.xlu0 %v164_v18  ;;  %v167_v22 = vadd.f32 %v166_v20, %v68_v14 }
 0x121   :  { %184 = vadd.xlane.f32.xlu1 %v175_v21 }
 0x122   :  { %180 = vadd.xlane.f32.xlu0 %v167_v22 }
 0x1aa   :  { %v183_v23 = vpop.xlane.xlu1 %182 }
 0x1ab   :  { %v179_v24 = vpop.xlane.xlu0 %178  ;;  %v188_v25 = vmul.f32 0.03125, %v183_v23 }
 0x1ac   :  { %v186_v26 = vmul.f32 0.03125, %v179_v24 }
 0x1ad   :  { %v192_v33 = vsub.f32 %v172_v16, %v188_v25  ;;  %v208_v42 = vmul.f32 96.0, %v188_v25 }
 0x1ae   :  { %v185_v27 = vpop.xlane.xlu1 %184  ;;  %v190_v28 = vsub.f32 %v164_v18, %v186_v26  ;;  %v206_v39 = vmul.f32 96.0, %v186_v26 }
 0x1af   :  { %v181_v29 = vpop.xlane.xlu0 %180  ;;  %v189_v30 = vmul.f32 0.03125, %v185_v27  ;;  %v196_v35 = vmul.f32 %v192_v33, %v192_v33  ;;  %v212_v47 = vmul.f32 %v208_v42, %v188_v25 }
 0x1b0   :  { %v187_v31 = vmul.f32 0.03125, %v181_v29  ;;  %v194_v32 = vmul.f32 %v190_v28, %v190_v28  ;;  %v210_v40 = vmul.f32 %v206_v39, %v186_v26 }
 0x1b1   :  { %v193_v37 = vsub.f32 %v175_v21, %v189_v30  ;;  %v209_v48 = vmul.f32 96.0, %v189_v30 }
 0x1b2   :  { %198 = vadd.xlane.f32.xlu0 %v194_v32  ;;  %v191_v34 = vsub.f32 %v167_v22, %v187_v31  ;;  %v207_v41 = vmul.f32 96.0, %v187_v31 }
 0x1b3   :  { %v197_v38 = vmul.f32 %v193_v37, %v193_v37  ;;  %v213_v57 = vmul.f32 %v209_v48, %v189_v30 }
 0x1b4   :  { %v195_v36 = vmul.f32 %v191_v34, %v191_v34  ;;  %v211_v46 = vmul.f32 %v207_v41, %v187_v31 }
 0x1b6   :  { %202 = vadd.xlane.f32.xlu0 %v196_v35  ;;  %200 = vadd.xlane.f32.xlu1 %v195_v36 }
 0x1ba   :  { %204 = vadd.xlane.f32.xlu1 %v197_v38 }
 0x23f   :  { %v199_v43 = vpop.xlane.xlu0 %198 }
 0x240   :  { %v214_v44 = vsub.f32 %v199_v43, %v210_v40 }
 0x242   :  { %v218_v45 = vmul.f32 0.03125, %v214_v44 }
 0x243   :  { %v201_v49 = vpop.xlane.xlu1 %200  ;;  %v203_v50 = vpop.xlane.xlu0 %202 }
 0x244   :  { %v222_v51 = vmax.f32 %v218_v45, 0.0  ;;  %v215_v52 = vsub.f32 %v201_v49, %v211_v46  ;;  %v216_v53 = vsub.f32 %v203_v50, %v212_v47 }
 0x246   :  { %v226_v54 = vadd.f32 1e-06, %v222_v51  ;;  %v219_v55 = vmul.f32 0.03125, %v215_v52  ;;  %v220_v56 = vmul.f32 0.03125, %v216_v53 }
 0x247   :  { %v205_v58 = vpop.xlane.xlu1 %204 }
 0x248   :  { %366 = vrsqrt.f32 %v226_v54  ;;  %v223_v59 = vmax.f32 %v219_v55, 0.0  ;;  %v224_v60 = vmax.f32 %v220_v56, 0.0  ;;  %v217_v61 = vsub.f32 %v205_v58, %v213_v57 }
 0x24a   :  { %v227_v62 = vadd.f32 1e-06, %v223_v59  ;;  %v228_v63 = vadd.f32 1e-06, %v224_v60  ;;  %v221_v0 = vmul.f32 0.03125, %v217_v61 }
 0x24c   :  { %368 = vrsqrt.f32 %v227_v62  ;;  %v225_v1 = vmax.f32 %v221_v0, 0.0 }
 0x24d   :  { %370 = vrsqrt.f32 %v228_v63 }
 0x24e   :  { %v229_v2 = vadd.f32 1e-06, %v225_v1 }
 0x250   :  { %372 = vrsqrt.f32 %v229_v2 }
 0x252   :  { %v367_v4 = vpop.eup %366 }
 0x253   :  { %v234_v7 = vmul.f32 %v367_v4, %v190_v28 }
 0x255   :  { %v242_v14 = vmul.f32 %v241_v5, %v234_v7 }
 0x256   :  { %v369_v8 = vpop.eup %368 }
 0x257   :  { %v371_v9 = vpop.eup %370  ;;  %v235_v12 = vmul.f32 %v369_v8, %v191_v34  ;;  %v250_v20 = vadd.f32 %v249_v10, %v242_v14 }
 0x258   :  { %v236_v15 = vmul.f32 %v371_v9, %v192_v33 }
 0x259   :  { %v243_v16 = vmul.f32 %v241_v5, %v235_v12 }
 0x25a   :  { %v373_v17 = vpop.eup %372  ;;  %v244_v19 = vmul.f32 %v241_v5, %v236_v15 }
 0x25b   :  { %v237_v18 = vmul.f32 %v373_v17, %v193_v37  ;;  %v251_v21 = vadd.f32 %v249_v10, %v243_v16 }
 0x25c   :  { %v252_v24 = vadd.f32 %v249_v10, %v244_v19 }
 0x25d   :  { %v245_v22 = vmul.f32 %v241_v5, %v237_v18  ;;  %v313_v23 = vpack.c.bf16 %v251_v21, %v250_v20 }
 0x25f   :  { %v253_v11 = vadd.f32 %v249_v10, %v245_v22  ;;  %314 = vst [vmem:[#allocation7] sm:$0xff] %v313_v23  }
 0x261   :  { %v318_v25 = vpack.c.bf16 %v253_v11, %v252_v24 }
 0x263   :  { %320 = vst [vmem:[#allocation7 + $0x8] sm:$0xff] %v318_v25  }
 0x264   :  { %429 = shalt.err (!%p426_p6)
}
 0x265   :  { %s430_s15 = scalar_lea.hbm %s532_s3, 256 }
 0x266   :  { %p431_p7 = scmp.ne.s32.totalorder %s532_s3, %s430_s15  ;;  %p434_p8 = scmp.lt.u32.totalorder %s430_s15, %s532_s3 }
 0x268   :  { %p436_p9 = pnand %p434_p8, %p431_p7 }
 0x26a   :  { %439 = shalt.err (!%p436_p9)
}
 0x26b   :  { %285 = dma.vmem_to_hbm [thread:$0]  %s280_s11, 256, %s532_s3, [#allocation4], %s447_s22, %s447_s22, %s448_s23  }
 0x26c   :  { %444 = dma.done.wait [#allocation4], 256  }
 0x26d   :  { %445 = vsyncadd [#allocation4], 4294967040 }
 0x26e   :  { %289 = vsyncpa [#allocation3], 1 }
 0x26f   :  { %290 = vsyncpa [#allocation6], 1 }
 0x270   :  { %291 = vsyncpa [#allocation4], 1 }

</bundles_post_ra>
